<compile_context>
chip_gen: v6e
topology: v6e:2x2x1
jax: 0.10.0
libtpu: 0.0.40
codegen_flags: <defaults>
</compile_context>

<pallas_src>
import functools

import jax
import jax.numpy as jnp
from jax import lax
from jax.experimental import pallas as pl
from jax.experimental.pallas import tpu as pltpu


_LANE = 128
# ~2 MiB of VMEM per input block -> 2 inputs x 2 pipeline buffers = 8 MiB.
_TARGET_BLOCK_BYTES = 2 * 1024 * 1024


def _round_up(x, m):
    return (x + m - 1) // m * m


def _round_down(x, m):
    return x // m * m


def _ssd_kernel(qk_ref, qkf_ref, out_ref, acc_ref, *,
                rows, block_rows, bps, needs_mask):
    """Sum of squared differences over the (rows, lane) q_k pair.

    Grid: (num_splits [parallel], bps [arbitrary]).  Each split accumulates
    into a small (8, lane) f32 VMEM accumulator and writes one scalar to its
    own output slot on its last inner step.
    """
    c = pl.program_id(0)
    j = pl.program_id(1)

    @pl.when(j == 0)
    def _init():
        acc_ref[...] = jnp.zeros_like(acc_ref)

    d = qkf_ref[...].astype(jnp.float32) - qk_ref[...].astype(jnp.float32)
    dsq = d * d
    if needs_mask:
        # Global row offset of this (possibly overhanging / duplicated) block,
        # computed from the UNclamped block index so duplicate blocks zero out.
        row_start = (c * bps + j) * block_rows
        valid = rows - row_start                      # <= 0 for duplicate blocks
        local = lax.broadcasted_iota(jnp.int32, dsq.shape, 0)
        dsq = jnp.where(local < valid, dsq, 0.0)

    # Row-group partial reduce: pure VALU adds into a tiny resident accumulator
    # (no per-step cross-lane reduce, no big read-modify-write accumulator).
    acc_ref[...] += jnp.sum(dsq.reshape(block_rows // 8, 8, dsq.shape[-1]), axis=0)

    @pl.when(j == pl.num_programs(1) - 1)
    def _finalize():
        out_ref[0, 0] = jnp.sum(acc_ref[...])


def _num_parallel_splits():
    # Engage both TensorCores on v7x; single stream on v5e/v6e (1 TC/chip).
    try:
        kind = jax.devices()[0].device_kind.lower()
    except Exception:
        return 1
    return 2 if "v7" in kind else 1


def feature_loss(q_i, q_i_feature, q_k, q_k_feature):
    B, D = q_i.shape
    _, K, _ = q_k.shape
    count = B * (K + 1) * D
    scale = jnp.float32(64.0 / count)

    # Tiny q_i pair: plain-jnp reduction in the wrapper (B*D elements).
    qi_ssd = jnp.sum(
        (q_i_feature.astype(jnp.float32) - q_i.astype(jnp.float32)) ** 2)

    nk = B * K * D
    if nk == 0:
        return qi_ssd * scale

    # Copy-free 2-D view of the q_k pair (contiguous reshape only, no pad).
    if nk % _LANE == 0:
        lane, rows = _LANE, nk // _LANE           # fully lane-dense
    else:
        lane, rows = D, B * K                     # block last dim == full D (allowed)
    qk2 = q_k.reshape(rows, lane)
    qkf2 = q_k_feature.reshape(rows, lane)

    itemsize = jnp.dtype(q_k.dtype).itemsize
    sub = max(8, 32 // itemsize)                  # sublane packing: f32 8 / bf16 16 / i8 32
    vmem_row_bytes = _round_up(lane, _LANE) * itemsize
    cap = max(sub, _round_down(_TARGET_BLOCK_BYTES // vmem_row_bytes, sub))
    block_rows = min(_round_up(rows, sub), cap)

    num_blocks = pl.cdiv(rows, block_rows)
    num_splits = min(_num_parallel_splits(), num_blocks)
    bps = pl.cdiv(num_blocks, num_splits)         # blocks per split
    needs_clamp = bps * num_splits != num_blocks
    needs_mask = needs_clamp or (num_blocks * block_rows != rows)

    def qk_index_map(c, j):
        g = c * bps + j
        if needs_clamp:
            g = jnp.minimum(g, num_blocks - 1)    # keep duplicate blocks in-bounds
        return (g, 0)

    kernel = functools.partial(
        _ssd_kernel, rows=rows, block_rows=block_rows, bps=bps,
        needs_mask=needs_mask)

    partials = pl.pallas_call(
        kernel,
        out_shape=jax.ShapeDtypeStruct((num_splits, 1), jnp.float32),
        grid_spec=pltpu.PrefetchScalarGridSpec(
            num_scalar_prefetch=0,
            grid=(num_splits, bps),
            in_specs=[
                pl.BlockSpec((block_rows, lane), qk_index_map),
                pl.BlockSpec((block_rows, lane), qk_index_map),
            ],
            out_specs=pl.BlockSpec(
                (1, 1), lambda c, j: (c, 0), memory_space=pltpu.SMEM),
            scratch_shapes=[pltpu.VMEM((8, lane), jnp.float32)],
        ),
        compiler_params=pltpu.CompilerParams(
            dimension_semantics=("parallel", "arbitrary")),
    )(qk2, qkf2)

    return (jnp.sum(partials) + qi_ssd) * scale


def feature_loss_ref(q_i, q_i_feature, q_k, q_k_feature):
    id_vec = jnp.concatenate([q_i[:, None, :], q_k], axis=1)
    feature_vec = jnp.concatenate([q_i_feature[:, None, :], q_k_feature], axis=1)
    return jnp.mean((feature_vec - id_vec) ** 2) * 64.0


if __name__ == "__main__":
    # Small deterministic inputs consistent with the forward's shape contract.
    B, K, D = 2, 4, 32
    key = jax.random.PRNGKey(0)
    k1, k2, k3, k4 = jax.random.split(key, 4)
    q_i = jax.random.normal(k1, (B, D), dtype=jnp.float32)
    q_i_feature = jax.random.normal(k2, (B, D), dtype=jnp.float32)
    q_k = jax.random.normal(k3, (B, K, D), dtype=jnp.float32)
    q_k_feature = jax.random.normal(k4, (B, K, D), dtype=jnp.float32)

    loss = feature_loss(q_i, q_i_feature, q_k, q_k_feature)
    jax.block_until_ready(loss)

    ref = feature_loss_ref(q_i, q_i_feature, q_k, q_k_feature)
    assert jnp.allclose(loss, ref, rtol=1e-5, atol=1e-5), (loss, ref)

    print("KERNEL_OK")
</pallas_src>

<mosaic_0001>
module attributes {stable_mosaic.version = 11 : i64} {
  func.func @_ssd_kernel(%arg0: i32, %arg1: i32, %arg2: memref<8x128xf32, #tpu.memory_space<vmem>>, %arg3: memref<8x128xf32, #tpu.memory_space<vmem>>, %arg4: memref<1x1xf32, #tpu.memory_space<smem>>, %arg5: memref<8x128xf32, #tpu.memory_space<vmem>>) attributes {dimension_semantics = [#tpu.dimension_semantics<parallel>, #tpu.dimension_semantics<arbitrary>], iteration_bounds = array<i64: 1, 1>, scalar_prefetch = 0 : i64, scratch_operands = 1 : i64, tpu.core_type = #tpu.core_type<tc>, window_params = [{transform_indices = @transform_0, window_bounds = array<i64: 8, 128>}, {transform_indices = @transform_1, window_bounds = array<i64: 8, 128>}, {transform_indices = @transform_2, window_bounds = array<i64: 1, 1>}]} {
    %c0_i32 = arith.constant 0 : i32
    %0 = arith.cmpi eq, %arg1, %c0_i32 : i32
    %1 = arith.extui %0 : i1 to i32
    %c0_i32_0 = arith.constant 0 : i32
    %2 = arith.cmpi ne, %1, %c0_i32_0 : i32
    scf.if %2 {
      %cst_11 = arith.constant 0.000000e+00 : f32
      %24 = vector.broadcast %cst_11 : f32 to vector<8x128xf32>
      %c0_12 = arith.constant 0 : index
      %c0_13 = arith.constant 0 : index
      %25 = vector.load %arg5[%c0_12, %c0_13] : memref<8x128xf32, #tpu.memory_space<vmem>>, vector<8x128xf32>
      tpu.vector_store %arg5[%c0_12, %c0_13], %24 {strides = array<i32>} : memref<8x128xf32, #tpu.memory_space<vmem>>, vector<8x128xf32>,
    } else {
    }
    %c0 = arith.constant 0 : index
    %c0_1 = arith.constant 0 : index
    %3 = vector.load %arg3[%c0, %c0_1] : memref<8x128xf32, #tpu.memory_space<vmem>>, vector<8x128xf32>
    %c0_2 = arith.constant 0 : index
    %c0_3 = arith.constant 0 : index
    %4 = vector.load %arg2[%c0_2, %c0_3] : memref<8x128xf32, #tpu.memory_space<vmem>>, vector<8x128xf32>
    %5 = arith.subf %3, %4 : vector<8x128xf32>
    %6 = arith.mulf %5, %5 : vector<8x128xf32>
    %c1_i32 = arith.constant 1 : i32
    %7 = arith.muli %arg0, %c1_i32 : i32
    %8 = arith.addi %7, %arg1 : i32
    %c8_i32 = arith.constant 8 : i32
    %9 = arith.muli %8, %c8_i32 : i32
    %c2_i32 = arith.constant 2 : i32
    %10 = arith.subi %c2_i32, %9 : i32
    %11 = tpu.iota {dimensions = array<i32: 0>} : vector<8x128xi32>
    %12 = vector.broadcast %10 : i32 to vector<8x128xi32>
    %13 = arith.cmpi slt, %11, %12 : vector<8x128xi32>
    %cst = arith.constant 0.000000e+00 : f32
    %14 = vector.broadcast %cst : f32 to vector<8x128xf32>
    %15 = arith.select %13, %6, %14 : vector<8x128xi1>, vector<8x128xf32>
    %c0_4 = arith.constant 0 : index
    %c0_5 = arith.constant 0 : index
    %16 = vector.load %arg5[%c0_4, %c0_5] : memref<8x128xf32, #tpu.memory_space<vmem>>, vector<8x128xf32>
    %17 = vector.shape_cast %15 : vector<8x128xf32> to vector<1x8x128xf32>
    %cst_6 = arith.constant dense<0.000000e+00> : vector<8x128xf32>
    %18 = vector.multi_reduction <add>, %17, %cst_6 [0] : vector<1x8x128xf32> to vector<8x128xf32>
    %19 = arith.addf %16, %18 : vector<8x128xf32>
    %c0_7 = arith.constant 0 : index
    %c0_8 = arith.constant 0 : index
    %20 = vector.load %arg5[%c0_7, %c0_8] : memref<8x128xf32, #tpu.memory_space<vmem>>, vector<8x128xf32>
    tpu.vector_store %arg5[%c0_7, %c0_8], %19 {strides = array<i32>} : memref<8x128xf32, #tpu.memory_space<vmem>>, vector<8x128xf32>,
    %c0_i32_9 = arith.constant 0 : i32
    %21 = arith.cmpi eq, %arg1, %c0_i32_9 : i32
    %22 = arith.extui %21 : i1 to i32
    %c0_i32_10 = arith.constant 0 : i32
    %23 = arith.cmpi ne, %22, %c0_i32_10 : i32
    scf.if %23 {
      %c0_11 = arith.constant 0 : index
      %c0_12 = arith.constant 0 : index
      %24 = vector.load %arg5[%c0_11, %c0_12] : memref<8x128xf32, #tpu.memory_space<vmem>>, vector<8x128xf32>
      %25 = vector.shape_cast %24 : vector<8x128xf32> to vector<1x8x128xf32>
      %cst_13 = arith.constant dense<0.000000e+00> : vector<1xf32>
      %26 = vector.multi_reduction <add>, %25, %cst_13 [1, 2] : vector<1x8x128xf32> to vector<1xf32>
      %27 = vector.shape_cast %26 : vector<1xf32> to vector<1x1x1xf32>
      %28 = vector.extract %27[0, 0, 0] : f32 from vector<1x1x1xf32>
      %c0_14 = arith.constant 0 : index
      %c0_15 = arith.constant 0 : index
      %29 = memref.load %arg4[%c0_14, %c0_15] : memref<1x1xf32, #tpu.memory_space<smem>>
      memref.store %28, %arg4[%c0_14, %c0_15] : memref<1x1xf32, #tpu.memory_space<smem>>
    } else {
    }
    return
  }
  func.func @transform_0(%arg0: i32, %arg1: i32) -> (i32, i32) {
    %c1_i32 = arith.constant 1 : i32
    %0 = arith.muli %arg0, %c1_i32 : i32
    %1 = arith.addi %0, %arg1 : i32
    %c0_i32 = arith.constant 0 : i32
    %c0_i32_0 = arith.constant 0 : i32
    return %1, %c0_i32 : i32, i32
  }
  func.func @transform_1(%arg0: i32, %arg1: i32) -> (i32, i32) {
    %c1_i32 = arith.constant 1 : i32
    %0 = arith.muli %arg0, %c1_i32 : i32
    %1 = arith.addi %0, %arg1 : i32
    %c0_i32 = arith.constant 0 : i32
    %c0_i32_0 = arith.constant 0 : i32
    return %1, %c0_i32 : i32, i32
  }
  func.func @transform_2(%arg0: i32, %arg1: i32) -> (i32, i32) {
    %c0_i32 = arith.constant 0 : i32
    %c0_i32_0 = arith.constant 0 : i32
    return %arg0, %c0_i32 : i32, i32
  }
}

</mosaic_0001>

<bundles_post_ra>
// kernel: tpu_custom_call.1
= control target key start
LH: loop header
LB: loop body
LE: loop exit
PB: predicated region body
PF: predicated region fallthrough
CT: control target
= control target key end

     0   :  { %7 = vsyncpa [#allocation4], 0  ;;  %s205_s0 = inlined_call_operand.hbm [shape: f32[2,128], index: 0, kind: input, shape index: {}]   ;;  %s206_s1 = inlined_call_operand.hbm [shape: f32[2,128], index: 1, kind: input, shape index: {}]   ;;  %s207_s2 = inlined_call_operand.hbm [shape: f32[1,1], index: 2, kind: output, shape index: {}]  }
   0x1   :  { %8 = vsyncpa [#allocation7], 0 }
   0x2   :  { %9 = vsyncpa [#allocation5], 0 }
   0x3   :  { %18 = vsyncadd [#allocation4], 96  ;;  %s176_s9 = smov [#allocation3]  }
   0x4   :  { %s23_s10 = sshll.u32 %s176_s9, 4  ;;  %s24_s10 = int_to_ptr.vmem [resolvable:$true] %s23_s10 }
   0x5   :  { %s130_s11 = scalar_lea.vmem %s24_s10, 32  ;;  %s134_s12 = scalar_lea.vmem %s24_s10, 128 }
   0x6   :  { %p131_p0 = scmp.ne.s32.totalorder %s24_s10, %s130_s11  ;;  %p135_p1 = scmp.lt.s32.totalorder %s24_s10, %s24_s10 }
   0x7   :  { %p136_p2 = scmp.lt.s32.totalorder %s134_s12, %s130_s11 }
   0x9   :  { %p137_p3 = por %p136_p2, %p135_p1 }
   0xb   :  { %p138_p4 = pnand %p137_p3, %p131_p0 }
   0xd   :  { %141 = shalt.err (!%p138_p4)
}
   0xe   :  { %s177_s13 = smov 32   ;;  %s178_s14 = smov 2  }
   0xf   :  { %29 = dma.hbm_to_vmem [thread:$0]  %s205_s0, 32, %s24_s10, [#allocation4], %s177_s13, %s177_s13, %s178_s14  }
  0x10   :  { %38 = vsyncadd [#allocation7], 96  ;;  %s179_s17 = smov [#allocation6]  }
  0x11   :  { %s43_s18 = sshll.u32 %s179_s17, 4  ;;  %s44_s18 = int_to_ptr.vmem [resolvable:$true] %s43_s18 }
  0x12   :  { %s150_s19 = scalar_lea.vmem %s44_s18, 32  ;;  %s154_s20 = scalar_lea.vmem %s44_s18, 128 }
  0x13   :  { %p151_p5 = scmp.ne.s32.totalorder %s44_s18, %s150_s19  ;;  %p155_p6 = scmp.lt.s32.totalorder %s44_s18, %s44_s18 }
  0x14   :  { %p156_p7 = scmp.lt.s32.totalorder %s154_s20, %s150_s19 }
  0x16   :  { %p157_p8 = por %p156_p7, %p155_p6 }
  0x18   :  { %p158_p9 = pnand %p157_p8, %p151_p5 }
  0x1a   :  { %161 = shalt.err (!%p158_p9)
}
  0x1b   :  { %49 = dma.hbm_to_vmem [thread:$0]  %s206_s1, 32, %s44_s18, [#allocation7], %s177_s13, %s177_s13, %s178_s14  }
  0x1c   :  { %170 = dma.done.wait [#allocation4], 128  }
  0x1d   :  { %171 = vsyncadd [#allocation4], 4294967168 }
  0x1e   :  { %172 = dma.done.wait [#allocation7], 128  }
  0x1f   :  { %173 = vsyncadd [#allocation7], 4294967168  ;;  %v76_v0 = vlaneseq  ;;  %v69_v2 = vld [vmem:[#allocation6] sm:$0xff]  ;;  %v70_v3 = vld [vmem:[#allocation3] sm:$0xff]  ;;  %s180_s1 = smov [#allocation8]  }
  0x20   :  { %v71_v4 = vsub.f32 %v69_v2, %v70_v3 }
  0x21   :  { %v77_v1 = vshrl.u32 %v76_v0, 7 }
  0x22   :  { %v72_v5 = vmul.f32 %v71_v4, %v71_v4 }
  0x23   :  { %vm79_vm0 = vcmp.lt.s32.totalorder %v77_v1, 2 }
  0x24   :  { %v80_v6 = vsel %vm79_vm0, %v72_v5, 0.0 }
  0x25   :  { %89 = vadd.xlane.f32.xlu0 %v80_v6 }
  0xae   :  { %v90_v7 = vpop.xlane.xlu0 %89 }
  0xaf   :  { %v91_v8 = vrot.slane %v90_v7, 4 }
  0xb1   :  { %v92_v9 = vadd.f32 %v91_v8, %v90_v7 }
  0xb3   :  { %v93_v10 = vrot.slane %v92_v9, 2 }
  0xb5   :  { %v94_v11 = vadd.f32 %v93_v10, %v92_v9 }
  0xb7   :  { %v95_v12 = vrot.slane %v94_v11, 1 }
  0xb9   :  { %v96_v13 = vadd.f32 %v95_v12, %v94_v11 }
  0xbb   :  { %115 = vpush %v96_v13 }
  0xec   :  { %s116_s0 = spop %115 }
  0xed   :  { %99 = sst [smem:[#allocation8]] %s116_s0 }
  0xee   :  { %107 = dma.smem_to_hbm %s180_s1, 16, %s207_s2, [#allocation5]  }
  0xef   :  { %174 = dma.done.wait [#allocation5], 16  }
  0xf0   :  { %175 = vsyncadd [#allocation5], 4294967280 }
  0xf1   :  { %111 = sfence }
  0xf2   :  { %112 = vsyncpa [#allocation4], 1 }
  0xf3   :  { %113 = vsyncpa [#allocation7], 1 }
  0xf4   :  { %114 = vsyncpa [#allocation5], 1 }

</bundles_post_ra>
